<compile_context>
chip_gen: v6e
topology: v6e:2x2x1
jax: 0.10.0
libtpu: 0.0.40
codegen_flags: <defaults>
</compile_context>

<pallas_src>
import functools

import jax
import jax.numpy as jnp
from jax.experimental import pallas as pl
from jax.experimental.pallas import tpu as pltpu


def _round_up(x, m):
    return (x + m - 1) // m * m


def _pick_row_tile(M, tm_max=512):
    """Row tile: multiple of 8; prefers an exact divisor of M with >= 2 grid steps."""
    cap = min(tm_max, _round_up(M, 8))
    cap -= cap % 8
    cap = max(cap, 8)
    for tm in range(cap, 7, -8):
        if M % tm == 0 and M // tm >= 2:
            return tm, M                    # no row padding, >= 2 steps (v7x megacore)
    return cap, _round_up(M, cap)           # fallback: pad rows, slice after kernel


# -------------- fused projection (conv-as-matmul) + bias + LayerNorm kernel --------------

def _proj_ln_kernel(x_ref, w_ref, p_ref, o_ref, *, eps):
    # x_ref : (tm, K0)  patch vectors (bf16 or f32), K0 = P*P*Cin unpadded
    # w_ref : (K0, C)   conv weight reordered to (kh, kw, c_in) -> c_out, unpadded
    # p_ref : (3, C)    f32 [conv bias ; LN gamma ; LN beta]
    # o_ref : (tm, C)   f32 output block (block width == true channel count)
    acc = jnp.dot(x_ref[...], w_ref[...], preferred_element_type=jnp.float32)
    acc = acc + p_ref[0:1, :]                       # conv bias
    inv_c = 1.0 / acc.shape[-1]
    mean = jnp.sum(acc, axis=-1, keepdims=True) * inv_c
    cen = acc - mean
    var = jnp.sum(cen * cen, axis=-1, keepdims=True) * inv_c   # no masking needed
    xn = cen * jax.lax.rsqrt(var + eps)             # PyTorch LayerNorm default eps
    o_ref[...] = (xn * p_ref[1:2, :] + p_ref[2:3, :]).astype(o_ref.dtype)


def fused_patch_ln(patches, w_mat, bias, gamma, beta, *, tm_max=512, eps=1e-5):
    """LayerNorm(patches @ w_mat + bias) fused in one pallas_call.

    patches: (M, K0)   w_mat: (K0, C)   bias/gamma/beta: (C,)   ->  (M, C) f32
    K0 and C are used unpadded (full-array block dims).
    """
    M, K0 = patches.shape
    C = w_mat.shape[1]
    tm, Mp = _pick_row_tile(M, tm_max)
    if Mp != M:
        patches = jnp.pad(patches, ((0, Mp - M), (0, 0)))

    params = jnp.stack([bias, gamma, beta]).astype(jnp.float32)          # (3, C)

    # VMEM budget: 2x (double-buffered) LHS + output blocks, 2x weight/params copies.
    # Only raise the scoped limit when actually needed (v7x: 64 MiB physical).
    need = 2 * (tm * K0 * patches.dtype.itemsize + tm * C * 4) \
         + 2 * (K0 * C * w_mat.dtype.itemsize + 8 * C * 4)
    vmem_limit = int(min(need + (4 << 20), 48 << 20)) if need > (16 << 20) else None
    # TODO(synk): for very large K0*C stages, single-buffer the grid-invariant weight /
    # params operands (pipeline_mode=pl.Buffered(1)) instead of raising the VMEM limit.

    out = pl.pallas_call(
        functools.partial(_proj_ln_kernel, eps=eps),
        out_shape=jax.ShapeDtypeStruct((Mp, C), jnp.float32),
        grid_spec=pltpu.PrefetchScalarGridSpec(
            num_scalar_prefetch=0,
            grid=(Mp // tm,),
            in_specs=[
                pl.BlockSpec((tm, K0), lambda i: (i, 0)),   # full K0, no padding
                pl.BlockSpec((K0, C), lambda i: (0, 0)),    # grid-invariant weight
                pl.BlockSpec((3, C), lambda i: (0, 0)),     # grid-invariant bias/gamma/beta
            ],
            out_specs=pl.BlockSpec((tm, C), lambda i: (i, 0)),
        ),
        compiler_params=pltpu.CompilerParams(
            dimension_semantics=("parallel",),
            vmem_limit_bytes=vmem_limit,
        ),
    )(patches, w_mat, params)

    return out if Mp == M else out[:M]


# ------------------------------------ module forward -------------------------------------

def overlap_patch_merging(x_nchw, params, *, patch_size, stride, padding, use_bf16=True):
    """Pallas forward of OverlapPatchMerging.

    x_nchw: (B, C_in, H, W)  ->  ((B, Ho*Wo, C_out), Ho, Wo)
    """
    B, Cin, H, W = x_nchw.shape
    P, S, pad = patch_size, stride, padding
    Cout = params["conv_b"].shape[0]

    # NCHW -> NHWC + spatial zero-padding (wrapper glue)
    x_nhwc = jnp.transpose(x_nchw, (0, 2, 3, 1))
    x_p = jnp.pad(x_nhwc, ((0, 0), (pad, pad), (pad, pad), (0, 0)))
    Hp, Wp = H + 2 * pad, W + 2 * pad
    Ho = (Hp - P) // S + 1
    Wo = (Wp - P) // S + 1

    in_dtype = jnp.bfloat16 if use_bf16 else jnp.float32
    x_p = x_p.astype(in_dtype)   # cast before im2col: halves the patch-matrix HBM bytes

    # im2col: overlapping strided windows, K ordered (kh, kw, c_in) to match w_mat.
    # TODO(synk): move this into the kernel (in-kernel row-band DMA + patch formation).
    cols = []
    for di in range(P):
        for dj in range(P):
            cols.append(
                x_p[:, di:di + (Ho - 1) * S + 1:S, dj:dj + (Wo - 1) * S + 1:S, :])
    patches = jnp.concatenate(cols, axis=-1).reshape(B * Ho * Wo, P * P * Cin)

    y = fused_patch_ln(patches, params["w_mat"].astype(in_dtype), params["conv_b"],
                       params["ln_g"], params["ln_b"])
    return y.reshape(B, Ho * Wo, Cout), Ho, Wo


# -------------------------------- params & pure-JAX reference ----------------------------

def init_params(key, in_channels, out_channels, patch_size):
    k1, k2, k3, k4 = jax.random.split(key, 4)
    P = patch_size
    fan_in = in_channels * P * P
    w_oihw = jax.random.normal(
        k1, (out_channels, in_channels, P, P), jnp.float32) / jnp.sqrt(float(fan_in))
    conv_b = 0.1 * jax.random.normal(k2, (out_channels,), jnp.float32)
    # reorder conv weight to match the patch-vector layout (kh, kw, c_in) -> c_out
    w_mat = w_oihw.transpose(2, 3, 1, 0).reshape(P * P * in_channels, out_channels)
    return {
        "w_oihw": w_oihw,
        "w_mat": w_mat,
        "conv_b": conv_b,
        "ln_g": 1.0 + 0.1 * jax.random.normal(k3, (out_channels,), jnp.float32),
        "ln_b": 0.1 * jax.random.normal(k4, (out_channels,), jnp.float32),
    }


def reference(x_nchw, params, *, patch_size, stride, padding):
    """Pure-JAX reference mirroring the PyTorch module exactly (f32)."""
    y = jax.lax.conv_general_dilated(
        x_nchw, params["w_oihw"],
        window_strides=(stride, stride),
        padding=[(padding, padding), (padding, padding)],
        dimension_numbers=("NCHW", "OIHW", "NCHW"))
    y = y + params["conv_b"][None, :, None, None]
    B, C, Ho, Wo = y.shape
    t = y.reshape(B, C, Ho * Wo).transpose(0, 2, 1)        # (B, N, C)
    mean = jnp.mean(t, axis=-1, keepdims=True)
    var = jnp.mean(jnp.square(t - mean), axis=-1, keepdims=True)
    t = (t - mean) * jax.lax.rsqrt(var + 1e-5) * params["ln_g"] + params["ln_b"]
    return t, Ho, Wo


# ------------------------------------------ main ------------------------------------------

if __name__ == "__main__":
    # small SegFormer-style stage: Conv2d(16 -> 64, kernel=3, stride=2, padding=1)
    B, Cin, H, W = 2, 16, 32, 32
    Cout, P, S, pad = 64, 3, 2, 1

    key = jax.random.PRNGKey(0)
    kx, kp = jax.random.split(key)
    x = jax.random.normal(kx, (B, Cin, H, W), jnp.float32)
    params = init_params(kp, Cin, Cout, P)

    ref, Hr, Wr = reference(x, params, patch_size=P, stride=S, padding=pad)

    # default (bf16 matmul inputs, f32 accumulation + epilogue) — loose tolerance
    fwd = jax.jit(functools.partial(overlap_patch_merging,
                                    patch_size=P, stride=S, padding=pad, use_bf16=True))
    out, Ho, Wo = fwd(x, params)
    out = jax.block_until_ready(out)
    assert int(Ho) == Hr and int(Wo) == Wr
    assert out.shape == (B, Hr * Wr, Cout)
    assert jnp.allclose(out, ref, atol=3e-2, rtol=3e-2), "bf16 path mismatch vs reference"

    # full-f32 path — tight tolerance (verifies kernel math exactly)
    out32, _, _ = overlap_patch_merging(x, params, patch_size=P, stride=S,
                                        padding=pad, use_bf16=False)
    out32 = jax.block_until_ready(out32)
    assert jnp.allclose(out32, ref, atol=2e-4, rtol=2e-4), "f32 path mismatch vs reference"

    print("KERNEL_OK")
</pallas_src>

<mosaic_0001>
module attributes {stable_mosaic.version = 11 : i64} {
  func.func @_proj_ln_kernel(%arg0: i32, %arg1: memref<256x144xbf16, #tpu.memory_space<vmem>>, %arg2: memref<144x64xbf16, #tpu.memory_space<vmem>>, %arg3: memref<3x64xf32, #tpu.memory_space<vmem>>, %arg4: memref<256x64xf32, #tpu.memory_space<vmem>>) attributes {dimension_semantics = [#tpu.dimension_semantics<parallel>], iteration_bounds = array<i64: 2>, scalar_prefetch = 0 : i64, scratch_operands = 0 : i64, tpu.core_type = #tpu.core_type<tc>, window_params = [{transform_indices = @transform_0, window_bounds = array<i64: 256, 144>}, {pipeline_mode = #tpu.pipeline_mode<synchronous>, transform_indices = @transform_1, window_bounds = array<i64: 144, 64>}, {pipeline_mode = #tpu.pipeline_mode<synchronous>, transform_indices = @transform_2, window_bounds = array<i64: 3, 64>}, {transform_indices = @transform_3, window_bounds = array<i64: 256, 64>}]} {
    %c0 = arith.constant 0 : index
    %c0_0 = arith.constant 0 : index
    %0 = vector.load %arg1[%c0, %c0_0] : memref<256x144xbf16, #tpu.memory_space<vmem>>, vector<256x144xbf16>
    %c0_1 = arith.constant 0 : index
    %c0_2 = arith.constant 0 : index
    %1 = vector.load %arg2[%c0_1, %c0_2] : memref<144x64xbf16, #tpu.memory_space<vmem>>, vector<144x64xbf16>
    %cst = arith.constant dense<0.000000e+00> : vector<256x64xf32>
    %2 = tpu.matmul %0, %1, %cst {dimension_numbers = #tpu.dot_dimension_numbers<[1], [0], [0], [1], [0, 0, 1, 1], [], []>} : vector<256x144xbf16>, vector<144x64xbf16>, vector<256x64xf32> -> vector<256x64xf32>
    %c0_3 = arith.constant 0 : index
    %c0_4 = arith.constant 0 : index
    %3 = vector.load %arg3[%c0_3, %c0_4] : memref<3x64xf32, #tpu.memory_space<vmem>>, vector<1x64xf32>
    %4 = vector.broadcast %3 : vector<1x64xf32> to vector<256x64xf32>
    %5 = arith.addf %2, %4 : vector<256x64xf32>
    %cst_5 = arith.constant dense<0.000000e+00> : vector<256xf32>
    %6 = vector.multi_reduction <add>, %5, %cst_5 [1] : vector<256x64xf32> to vector<256xf32>
    %7 = vector.shape_cast %6 : vector<256xf32> to vector<256x1xf32>
    %cst_6 = arith.constant 1.562500e-02 : f32
    %8 = vector.broadcast %cst_6 : f32 to vector<256x1xf32>
    %9 = arith.mulf %7, %8 : vector<256x1xf32>
    %10 = vector.broadcast %9 : vector<256x1xf32> to vector<256x64xf32>
    %11 = arith.subf %5, %10 : vector<256x64xf32>
    %12 = arith.mulf %11, %11 : vector<256x64xf32>
    %cst_7 = arith.constant dense<0.000000e+00> : vector<256xf32>
    %13 = vector.multi_reduction <add>, %12, %cst_7 [1] : vector<256x64xf32> to vector<256xf32>
    %14 = vector.shape_cast %13 : vector<256xf32> to vector<256x1xf32>
    %cst_8 = arith.constant 1.562500e-02 : f32
    %15 = vector.broadcast %cst_8 : f32 to vector<256x1xf32>
    %16 = arith.mulf %14, %15 : vector<256x1xf32>
    %cst_9 = arith.constant 9.99999974E-6 : f32
    %17 = vector.broadcast %cst_9 : f32 to vector<256x1xf32>
    %18 = arith.addf %16, %17 : vector<256x1xf32>
    %19 = math.rsqrt %18 : vector<256x1xf32>
    %20 = vector.broadcast %19 : vector<256x1xf32> to vector<256x64xf32>
    %21 = arith.mulf %11, %20 : vector<256x64xf32>
    %c1 = arith.constant 1 : index
    %c0_10 = arith.constant 0 : index
    %22 = vector.load %arg3[%c1, %c0_10] : memref<3x64xf32, #tpu.memory_space<vmem>>, vector<1x64xf32>
    %23 = vector.broadcast %22 : vector<1x64xf32> to vector<256x64xf32>
    %24 = arith.mulf %21, %23 : vector<256x64xf32>
    %c2 = arith.constant 2 : index
    %c0_11 = arith.constant 0 : index
    %25 = vector.load %arg3[%c2, %c0_11] : memref<3x64xf32, #tpu.memory_space<vmem>>, vector<1x64xf32>
    %26 = vector.broadcast %25 : vector<1x64xf32> to vector<256x64xf32>
    %27 = arith.addf %24, %26 : vector<256x64xf32>
    %c0_12 = arith.constant 0 : index
    %c0_13 = arith.constant 0 : index
    %28 = vector.load %arg4[%c0_12, %c0_13] : memref<256x64xf32, #tpu.memory_space<vmem>>, vector<256x64xf32>
    tpu.vector_store %arg4[%c0_12, %c0_13], %27 {strides = array<i32>} : memref<256x64xf32, #tpu.memory_space<vmem>>, vector<256x64xf32>,
    return
  }
  func.func @transform_0(%arg0: i32) -> (i32, i32) {
    %c0_i32 = arith.constant 0 : i32
    %c0_i32_0 = arith.constant 0 : i32
    return %arg0, %c0_i32 : i32, i32
  }
  func.func @transform_1(%arg0: i32) -> (i32, i32) {
    %c0_i32 = arith.constant 0 : i32
    %c0_i32_0 = arith.constant 0 : i32
    %c0_i32_1 = arith.constant 0 : i32
    return %c0_i32, %c0_i32_0 : i32, i32
  }
  func.func @transform_2(%arg0: i32) -> (i32, i32) {
    %c0_i32 = arith.constant 0 : i32
    %c0_i32_0 = arith.constant 0 : i32
    %c0_i32_1 = arith.constant 0 : i32
    return %c0_i32, %c0_i32_0 : i32, i32
  }
  func.func @transform_3(%arg0: i32) -> (i32, i32) {
    %c0_i32 = arith.constant 0 : i32
    %c0_i32_0 = arith.constant 0 : i32
    return %arg0, %c0_i32 : i32, i32
  }
}

</mosaic_0001>

<bundles_post_ra>
// kernel: overlap_patch_merging.1
= control target key start
LH: loop header
LB: loop body
LE: loop exit
PB: predicated region body
PF: predicated region fallthrough
CT: control target
= control target key end

     0   :  { %s1470_s12 = smov 0   ;;  %s2100_s0 = inlined_call_operand.vmem [shape: bf16[512,144], index: 0, kind: input, shape index: {}]   ;;  %s2101_s1 = inlined_call_operand.vmem [shape: bf16[144,64], index: 1, kind: input, shape index: {}]   ;;  %s2102_s2 = inlined_call_operand.vmem [shape: f32[3,64], index: 2, kind: input, shape index: {}]   ;;  %s2103_s3 = inlined_call_operand.vmem [shape: f32[512,64], index: 3, kind: output, shape index: {}]  }
   0x1 LB: > { %s1220_s13 = sadd.s32 4294967295, %s1447_s12   ;;  %p1224_p0 = scmp.ge.s32.totalorder %s1447_s12, 1  ;;  %s1447_s12 = sphi %s1470_s12, %s13_s12  }
   0x2   : > { %p139_p1 = scmp.lt.s32.totalorder %s1447_s12, 3 }
   0x4   : > { %p140_p2 = pnand %p1224_p0, %p139_p1 }
   0x5   : > { %s1225_s16 = sshll.u32 (!%p140_p2), %s1220_s13, 5 }
   0x6   : > { %143 = sbr.rel (%p140_p2) target bundleno = 620 (0x26c), region = 32  ;;  %p165_p3 = scmp.lt.s32.totalorder (!%p140_p2), %s1225_s16, 63 }
   0xb   : > { %v1320_v0 = vld [vmem:[%s2101_s1 + $0x38] sm:$0xff]   ;;  %v1449_v1 = vmov 0   ;;  %v1321_v2 = vld [vmem:[%s2101_s1 + $0x30] sm:$0xff]   ;;  %s2105_s16 = smov (!%p165_p3, %s1225_s16), 63  ;;  %v1322_v3 = vld [vmem:[%s2101_s1 + $0x28] sm:$0xff]   ;;  %vm431_vm0 = vcmask 130048  }
   0xc   : > { %480 = vmatprep.subr.bf16.mxu0 %v1449_v1  ;;  %1293 = vmatprep.subr.bf16.mxu1 %v1449_v1  ;;  %s1292_s21 = sshll.u32 %s2105_s16, 3  ;;  %v1323_v4 = vld [vmem:[%s2101_s1 + $0x20] sm:$0xff]   ;;  %v1324_v7 = vld [vmem:[%s2101_s1 + $0x18] sm:$0xff]   ;;  %v1325_v8 = vld [vmem:[%s2101_s1 + $0x10] sm:$0xff]   ;;  %vm641_vm1 = vcmask 523264  }
   0xd   : > { %481 = vmatpush1.bf16.msra.mxu0 %v1320_v0  ;;  %1302 = vmatpush1.bf16.msra.mxu1 %v1320_v0  ;;  %s1495_s24 = scalar_lea.vmem %s2100_s0, %s1292_s21  ;;  %v1326_v9 = vld [vmem:[%s2101_s1 + $0x8] sm:$0xff]   ;;  %v1327_v10 = vld [vmem:[%s2101_s1] sm:$0xff]   ;;  %s1937_s20 = scalar_lea.vmem %s2103_s3, %s1292_s21 }
   0xe   : > { %482 = vmatprep.subr.bf16.mxu0 %v1449_v1  ;;  %1294 = vmatprep.subr.bf16.mxu1 %v1449_v1  ;;  %v1331_v5 = vld [vmem:[%s1495_s24 + $0x4] ss:$8 sps:$4 sm:$0xff]   ;;  %v1329_v12 = vld [vmem:[%s1495_s24] ss:$8 sps:$4 sm:$0xff]   ;;  %v1335_v14 = vld [vmem:[%s1495_s24 + $0x14] ss:$8 sps:$4 sm:$0xff]  }
   0xf   : > { %v1334_v6 = vld [vmem:[%s1495_s24 + $0x84] ss:$8 sps:$4 sm:$0xff]   ;;  %1272 = vmatprep.mubr.msk.bf16.mxu0 %vm431_vm0, %v1331_v5  ;;  %v1332_v13 = vld [vmem:[%s1495_s24 + $0x80] ss:$8 sps:$4 sm:$0xff]   ;;  %v1338_v15 = vld [vmem:[%s1495_s24 + $0x94] ss:$8 sps:$4 sm:$0xff]  }
  0x10   : > { %1280 = vmatprep.mubr.msk.bf16.mxu1 %vm431_vm0, %v1334_v6  ;;  %v1328_v11 = vld [vmem:[%s2101_s1 + $0x40] sm:$0xff]   ;;  %v1337_v16 = vld [vmem:[%s1495_s24 + $0x10] ss:$8 sps:$4 sm:$0xff]   ;;  %v1347_v22 = vld [vmem:[%s1495_s24 + $0x34] ss:$8 sps:$4 sm:$0xff]  }
  0x11   : > { %483 = vmatpush1.bf16.msra.mxu0 %v1321_v2  ;;  %1303 = vmatpush1.bf16.msra.mxu1 %v1321_v2  ;;  %v1340_v17 = vld [vmem:[%s1495_s24 + $0x90] ss:$8 sps:$4 sm:$0xff]   ;;  %v1341_v18 = vld [vmem:[%s1495_s24 + $0x24] ss:$8 sps:$4 sm:$0xff]   ;;  %v1343_v20 = vld [vmem:[%s1495_s24 + $0x20] ss:$8 sps:$4 sm:$0xff]  }
  0x12   : > { %484 = vmatprep.subr.bf16.mxu0 %v1449_v1  ;;  %1295 = vmatprep.subr.bf16.mxu1 %v1449_v1  ;;  %v1344_v19 = vld [vmem:[%s1495_s24 + $0xa4] ss:$8 sps:$4 sm:$0xff]   ;;  %v1346_v21 = vld [vmem:[%s1495_s24 + $0xa0] ss:$8 sps:$4 sm:$0xff]   ;;  %v1350_v23 = vld [vmem:[%s1495_s24 + $0xb4] ss:$8 sps:$4 sm:$0xff]  }
  0x13   : > { %v1349_v24 = vld [vmem:[%s1495_s24 + $0x30] ss:$8 sps:$4 sm:$0xff]   ;;  %v1353_v26 = vld [vmem:[%s1495_s24 + $0x44] ss:$8 sps:$4 sm:$0xff]   ;;  %v1355_v28 = vld [vmem:[%s1495_s24 + $0x40] ss:$8 sps:$4 sm:$0xff]  }
  0x14   : > { %v1352_v25 = vld [vmem:[%s1495_s24 + $0xb0] ss:$8 sps:$4 sm:$0xff]   ;;  %v1356_v27 = vld [vmem:[%s1495_s24 + $0xc4] ss:$8 sps:$4 sm:$0xff]   ;;  %v1358_v29 = vld [vmem:[%s1495_s24 + $0xc0] ss:$8 sps:$4 sm:$0xff]  }
  0x15   : > { %485 = vmatpush1.bf16.msra.mxu0 %v1322_v3  ;;  %1304 = vmatpush1.bf16.msra.mxu1 %v1322_v3  ;;  %v1359_v30 = vld [vmem:[%s1495_s24 + $0x54] ss:$8 sps:$4 sm:$0xff]   ;;  %v1361_v32 = vld [vmem:[%s1495_s24 + $0x50] ss:$8 sps:$4 sm:$0xff]   ;;  %v1365_v34 = vld [vmem:[%s1495_s24 + $0x64] ss:$8 sps:$4 sm:$0xff]  }
  0x16   : > { %486 = vmatprep.subr.bf16.mxu0 %v1449_v1  ;;  %1296 = vmatprep.subr.bf16.mxu1 %v1449_v1  ;;  %v1362_v31 = vld [vmem:[%s1495_s24 + $0xd4] ss:$8 sps:$4 sm:$0xff]   ;;  %v1364_v33 = vld [vmem:[%s1495_s24 + $0xd0] ss:$8 sps:$4 sm:$0xff]   ;;  %v1368_v35 = vld [vmem:[%s1495_s24 + $0xe4] ss:$8 sps:$4 sm:$0xff]  }
  0x17   : > { %v1367_v36 = vld [vmem:[%s1495_s24 + $0x60] ss:$8 sps:$4 sm:$0xff]   ;;  %v1371_v38 = vld [vmem:[%s1495_s24 + $0x74] ss:$8 sps:$4 sm:$0xff]   ;;  %v1373_v40 = vld [vmem:[%s1495_s24 + $0x70] ss:$8 sps:$4 sm:$0xff]  }
  0x18   : > { %v1370_v37 = vld [vmem:[%s1495_s24 + $0xe0] ss:$8 sps:$4 sm:$0xff]   ;;  %v1374_v39 = vld [vmem:[%s1495_s24 + $0xf4] ss:$8 sps:$4 sm:$0xff]   ;;  %v1376_v41 = vld [vmem:[%s1495_s24 + $0xf0] ss:$8 sps:$4 sm:$0xff]  }
  0x19   : > { %487 = vmatpush1.bf16.msra.mxu0 %v1323_v4  ;;  %1305 = vmatpush1.bf16.msra.mxu1 %v1323_v4  ;;  %v1566_v42 = vld [vmem:[%s2102_s2] ss:$0 sm:$0xff] }
  0x1a   : > { %488 = vmatprep.subr.bf16.mxu0 %v1449_v1  ;;  %1297 = vmatprep.subr.bf16.mxu1 %v1449_v1 }
  0x1d   : > { %489 = vmatpush1.bf16.msra.mxu0 %v1324_v7  ;;  %1306 = vmatpush1.bf16.msra.mxu1 %v1324_v7 }
  0x1e   : > { %490 = vmatprep.subr.bf16.mxu0 %v1449_v1  ;;  %1298 = vmatprep.subr.bf16.mxu1 %v1449_v1 }
  0x21   : > { %491 = vmatpush1.bf16.msra.mxu0 %v1325_v8  ;;  %1307 = vmatpush1.bf16.msra.mxu1 %v1325_v8 }
  0x22   : > { %492 = vmatprep.subr.bf16.mxu0 %v1449_v1  ;;  %1299 = vmatprep.subr.bf16.mxu1 %v1449_v1 }
  0x25   : > { %493 = vmatpush1.bf16.msra.mxu0 %v1326_v9  ;;  %1308 = vmatpush1.bf16.msra.mxu1 %v1326_v9 }
  0x26   : > { %494 = vmatprep.subr.bf16.mxu0 %v1449_v1  ;;  %1300 = vmatprep.subr.bf16.mxu1 %v1449_v1 }
  0x29   : > { %495 = vmatpush1.bf16.msra.mxu0 %v1327_v10  ;;  %1309 = vmatpush1.bf16.msra.mxu1 %v1327_v10 }
  0x2a   : > { %510 = vmatprep.subr.bf16.mxu0 %v1449_v1  ;;  %1301 = vmatprep.subr.bf16.mxu1 %v1449_v1 }
  0x2d   : > { %511 = vmatpush2.bf16.msra.mxu0 %v1328_v11  ;;  %1310 = vmatpush2.bf16.msra.mxu1 %v1328_v11 }
  0x30   : > { %513 = vmatmul.mubr.bf16.vlgmr.msra.gmra.mxu0 %v1329_v12  ;;  %577 = vmatmul.mubr.bf16.vlgmr.msra.gmra.mxu1 %v1332_v13 }
  0x31   : > { %1273 = vmatprep.mubr.msk.bf16.mxu0 %vm431_vm0, %v1335_v14  ;;  %1281 = vmatprep.mubr.msk.bf16.mxu1 %vm431_vm0, %v1338_v15 }
  0x38   : > { %521 = vmatmul.mubr.bf16.gmra.mxu0 %v1337_v16  ;;  %585 = vmatmul.mubr.bf16.gmra.mxu1 %v1340_v17 }
  0x39   : > { %1274 = vmatprep.mubr.msk.bf16.mxu0 %vm431_vm0, %v1341_v18  ;;  %1282 = vmatprep.mubr.msk.bf16.mxu1 %vm431_vm0, %v1344_v19 }
  0x40   : > { %529 = vmatmul.mubr.bf16.gmra.mxu0 %v1343_v20  ;;  %593 = vmatmul.mubr.bf16.gmra.mxu1 %v1346_v21 }
  0x41   : > { %1275 = vmatprep.mubr.msk.bf16.mxu0 %vm431_vm0, %v1347_v22  ;;  %1283 = vmatprep.mubr.msk.bf16.mxu1 %vm431_vm0, %v1350_v23 }
  0x48   : > { %537 = vmatmul.mubr.bf16.gmra.mxu0 %v1349_v24  ;;  %601 = vmatmul.mubr.bf16.gmra.mxu1 %v1352_v25 }
  0x49   : > { %1276 = vmatprep.mubr.msk.bf16.mxu0 %vm431_vm0, %v1353_v26  ;;  %1284 = vmatprep.mubr.msk.bf16.mxu1 %vm431_vm0, %v1356_v27 }
  0x50   : > { %545 = vmatmul.mubr.bf16.gmra.mxu0 %v1355_v28  ;;  %609 = vmatmul.mubr.bf16.gmra.mxu1 %v1358_v29 }
  0x51   : > { %1277 = vmatprep.mubr.msk.bf16.mxu0 %vm431_vm0, %v1359_v30  ;;  %1285 = vmatprep.mubr.msk.bf16.mxu1 %vm431_vm0, %v1362_v31 }
  0x58   : > { %553 = vmatmul.mubr.bf16.gmra.mxu0 %v1361_v32  ;;  %617 = vmatmul.mubr.bf16.gmra.mxu1 %v1364_v33 }
  0x59   : > { %1278 = vmatprep.mubr.msk.bf16.mxu0 %vm431_vm0, %v1365_v34  ;;  %1286 = vmatprep.mubr.msk.bf16.mxu1 %vm431_vm0, %v1368_v35 }
  0x60   : > { %561 = vmatmul.mubr.bf16.gmra.mxu0 %v1367_v36  ;;  %625 = vmatmul.mubr.bf16.gmra.mxu1 %v1370_v37 }
  0x61   : > { %1279 = vmatprep.mubr.msk.bf16.mxu0 %vm431_vm0, %v1371_v38  ;;  %1287 = vmatprep.mubr.msk.bf16.mxu1 %vm431_vm0, %v1374_v39 }
  0x68   : > { %569 = vmatmul.mubr.bf16.gmra.mxu0 %v1373_v40  ;;  %633 = vmatmul.mubr.bf16.gmra.mxu1 %v1376_v41 }
  0xf0   : > { %v514_v43 = vpop.f32.mrf.mxu0  ;;  %v578_v44 = vpop.f32.mrf.mxu1 }
  0xf1   : > { %v1569_v45 = vadd.f32 %v1566_v42, %v514_v43  ;;  %v1572_v46 = vadd.f32 %v1566_v42, %v578_v44 }
  0xf2   : > { %v516_v47 = vpop.f32.mrf.mxu0  ;;  %v580_v48 = vpop.f32.mrf.mxu1 }
  0xf3   : > { %v642_v49 = vsel %vm641_vm1, %v1569_v45, 0.0  ;;  %v690_v53 = vsel %vm641_vm1, %v1572_v46, 0.0 }
  0xf4   : > { %v517_v50 = vpop.f32.mrf.mxu0  ;;  %v581_v51 = vpop.f32.mrf.mxu1  ;;  %643 = vadd.xlane.f32.xlu0 %v642_v49 }
  0xf5   : > { %v1577_v52 = vadd.f32 %v1566_v42, %v581_v51  ;;  %v1582_v56 = vadd.f32 %v1566_v42, %v517_v50 }
  0xf6   : > { %v519_v54 = vpop.f32.mrf.mxu0  ;;  %v583_v55 = vpop.f32.mrf.mxu1 }
  0xf7   : > { %v693_v57 = vsel %vm641_vm1, %v1577_v52, 0.0  ;;  %v645_v1 = vsel %vm641_vm1, %v1582_v56, 0.0 }
  0xf8   : > { %694 = vadd.xlane.f32.xlu1 %v693_v57  ;;  %v522_v58 = vpop.f32.mrf.mxu0  ;;  %691 = vadd.xlane.f32.xlu0 %v690_v53  ;;  %v586_v59 = vpop.f32.mrf.mxu1 }
  0xf9   : > { %v1587_v60 = vadd.f32 %v1566_v42, %v522_v58  ;;  %v1590_v61 = vadd.f32 %v1566_v42, %v586_v59 }
  0xfa   : > { %v524_v62 = vpop.f32.mrf.mxu0  ;;  %v588_v63 = vpop.f32.mrf.mxu1 }
  0xfb   : > { %v648_v0 = vsel %vm641_vm1, %v1587_v60, 0.0  ;;  %v696_v6 = vsel %vm641_vm1, %v1590_v61, 0.0 }
  0xfc   : > { %v525_v2 = vpop.f32.mrf.mxu0  ;;  %649 = vadd.xlane.f32.xlu1 %v648_v0  ;;  %646 = vadd.xlane.f32.xlu0 %v645_v1  ;;  %v589_v3 = vpop.f32.mrf.mxu1 }
  0xfd   : > { %v1597_v4 = vadd.f32 %v1566_v42, %v525_v2  ;;  %v1600_v5 = vadd.f32 %v1566_v42, %v589_v3 }
  0xfe   : > { %v527_v7 = vpop.f32.mrf.mxu0  ;;  %v591_v8 = vpop.f32.mrf.mxu1 }
  0xff   : > { %v651_v9 = vsel %vm641_vm1, %v1597_v4, 0.0  ;;  %v699_v14 = vsel %vm641_vm1, %v1600_v5, 0.0 }
 0x100   : > { %v530_v10 = vpop.f32.mrf.mxu0  ;;  %652 = vadd.xlane.f32.xlu1 %v651_v9  ;;  %697 = vadd.xlane.f32.xlu0 %v696_v6  ;;  %v594_v11 = vpop.f32.mrf.mxu1 }
 0x101   : > { %v1607_v12 = vadd.f32 %v1566_v42, %v530_v10  ;;  %v1610_v13 = vadd.f32 %v1566_v42, %v594_v11 }
 0x102   : > { %v532_v15 = vpop.f32.mrf.mxu0  ;;  %v596_v16 = vpop.f32.mrf.mxu1 }
 0x103   : > { %v654_v17 = vsel %vm641_vm1, %v1607_v12, 0.0  ;;  %v702_v22 = vsel %vm641_vm1, %v1610_v13, 0.0 }
 0x104   : > { %v533_v18 = vpop.f32.mrf.mxu0  ;;  %700 = vadd.xlane.f32.xlu1 %v699_v14  ;;  %655 = vadd.xlane.f32.xlu0 %v654_v17  ;;  %v597_v19 = vpop.f32.mrf.mxu1 }
 0x105   : > { %v1617_v20 = vadd.f32 %v1566_v42, %v533_v18  ;;  %v1620_v21 = vadd.f32 %v1566_v42, %v597_v19 }
 0x106   : > { %v535_v23 = vpop.f32.mrf.mxu0  ;;  %v599_v24 = vpop.f32.mrf.mxu1 }
 0x107   : > { %v657_v25 = vsel %vm641_vm1, %v1617_v20, 0.0  ;;  %v705_v30 = vsel %vm641_vm1, %v1620_v21, 0.0 }
 0x108   : > { %v538_v26 = vpop.f32.mrf.mxu0  ;;  %658 = vadd.xlane.f32.xlu1 %v657_v25  ;;  %703 = vadd.xlane.f32.xlu0 %v702_v22  ;;  %v602_v27 = vpop.f32.mrf.mxu1 }
 0x109   : > { %v1627_v28 = vadd.f32 %v1566_v42, %v538_v26  ;;  %v1630_v29 = vadd.f32 %v1566_v42, %v602_v27 }
 0x10a   : > { %v540_v31 = vpop.f32.mrf.mxu0  ;;  %v604_v32 = vpop.f32.mrf.mxu1 }
 0x10b   : > { %v660_v33 = vsel %vm641_vm1, %v1627_v28, 0.0  ;;  %v708_v38 = vsel %vm641_vm1, %v1630_v29, 0.0 }
 0x10c   : > { %v541_v34 = vpop.f32.mrf.mxu0  ;;  %706 = vadd.xlane.f32.xlu1 %v705_v30  ;;  %661 = vadd.xlane.f32.xlu0 %v660_v33  ;;  %v605_v35 = vpop.f32.mrf.mxu1 }
 0x10d   : > { %v1637_v36 = vadd.f32 %v1566_v42, %v541_v34  ;;  %v1640_v37 = vadd.f32 %v1566_v42, %v605_v35 }
 0x10e   : > { %v543_v39 = vpop.f32.mrf.mxu0  ;;  %v607_v40 = vpop.f32.mrf.mxu1 }
 0x10f   : > { %v663_v41 = vsel %vm641_vm1, %v1637_v36, 0.0  ;;  %v711_v49 = vsel %vm641_vm1, %v1640_v37, 0.0 }
 0x110   : > { %v546_v43 = vpop.f32.mrf.mxu0  ;;  %664 = vadd.xlane.f32.xlu1 %v663_v41  ;;  %709 = vadd.xlane.f32.xlu0 %v708_v38  ;;  %v610_v44 = vpop.f32.mrf.mxu1 }
 0x111   : > { %v1647_v47 = vadd.f32 %v1566_v42, %v546_v43  ;;  %v1650_v48 = vadd.f32 %v1566_v42, %v610_v44 }
 0x112   : > { %v548_v50 = vpop.f32.mrf.mxu0  ;;  %v612_v51 = vpop.f32.mrf.mxu1 }
 0x113   : > { %v666_v53 = vsel %vm641_vm1, %v1647_v47, 0.0  ;;  %v714_v59 = vsel %vm641_vm1, %v1650_v48, 0.0 }
 0x114   : > { %v549_v54 = vpop.f32.mrf.mxu0  ;;  %712 = vadd.xlane.f32.xlu1 %v711_v49  ;;  %667 = vadd.xlane.f32.xlu0 %v666_v53  ;;  %v613_v55 = vpop.f32.mrf.mxu1 }
 0x115   : > { %v1657_v57 = vadd.f32 %v1566_v42, %v549_v54  ;;  %v1660_v58 = vadd.f32 %v1566_v42, %v613_v55 }
 0x116   : > { %v551_v62 = vpop.f32.mrf.mxu0  ;;  %v615_v63 = vpop.f32.mrf.mxu1 }
 0x117   : > { %v669_v0 = vsel %vm641_vm1, %v1657_v57, 0.0  ;;  %v717_v7 = vsel %vm641_vm1, %v1660_v58, 0.0 }
 0x118   : > { %v554_v1 = vpop.f32.mrf.mxu0  ;;  %670 = vadd.xlane.f32.xlu1 %v669_v0  ;;  %715 = vadd.xlane.f32.xlu0 %v714_v59  ;;  %v618_v2 = vpop.f32.mrf.mxu1 }
 0x119   : > { %v1667_v3 = vadd.f32 %v1566_v42, %v554_v1  ;;  %v1670_v6 = vadd.f32 %v1566_v42, %v618_v2 }
 0x11a   : > { %v556_v8 = vpop.f32.mrf.mxu0  ;;  %v620_v9 = vpop.f32.mrf.mxu1 }
 0x11b   : > { %v672_v10 = vsel %vm641_vm1, %v1667_v3, 0.0  ;;  %v720_v17 = vsel %vm641_vm1, %v1670_v6, 0.0 }
 0x11c   : > { %v557_v11 = vpop.f32.mrf.mxu0  ;;  %718 = vadd.xlane.f32.xlu1 %v717_v7  ;;  %673 = vadd.xlane.f32.xlu0 %v672_v10  ;;  %v621_v14 = vpop.f32.mrf.mxu1 }
 0x11d   : > { %v1677_v15 = vadd.f32 %v1566_v42, %v557_v11  ;;  %v1680_v16 = vadd.f32 %v1566_v42, %v621_v14 }
 0x11e   : > { %v559_v18 = vpop.f32.mrf.mxu0  ;;  %v623_v19 = vpop.f32.mrf.mxu1 }
 0x11f   : > { %v675_v22 = vsel %vm641_vm1, %v1677_v15, 0.0  ;;  %v723_v27 = vsel %vm641_vm1, %v1680_v16, 0.0 }
 0x120   : > { %v562_v23 = vpop.f32.mrf.mxu0  ;;  %676 = vadd.xlane.f32.xlu1 %v675_v22  ;;  %721 = vadd.xlane.f32.xlu0 %v720_v17  ;;  %v626_v24 = vpop.f32.mrf.mxu1 }
 0x121   : > { %v1687_v25 = vadd.f32 %v1566_v42, %v562_v23  ;;  %v1690_v26 = vadd.f32 %v1566_v42, %v626_v24 }
 0x122   : > { %v564_v30 = vpop.f32.mrf.mxu0  ;;  %v628_v31 = vpop.f32.mrf.mxu1 }
 0x123   : > { %v678_v32 = vsel %vm641_vm1, %v1687_v25, 0.0  ;;  %v726_v39 = vsel %vm641_vm1, %v1690_v26, 0.0 }
 0x124   : > { %v565_v33 = vpop.f32.mrf.mxu0  ;;  %724 = vadd.xlane.f32.xlu1 %v723_v27  ;;  %679 = vadd.xlane.f32.xlu0 %v678_v32  ;;  %v629_v34 = vpop.f32.mrf.mxu1 }
 0x125   : > { %v1697_v35 = vadd.f32 %v1566_v42, %v565_v33  ;;  %v1700_v38 = vadd.f32 %v1566_v42, %v629_v34 }
 0x126   : > { %v567_v40 = vpop.f32.mrf.mxu0  ;;  %v631_v41 = vpop.f32.mrf.mxu1 }
 0x127   : > { %v681_v43 = vsel %vm641_vm1, %v1697_v35, 0.0  ;;  %v729_v53 = vsel %vm641_vm1, %v1700_v38, 0.0 }
 0x128   : > { %v570_v44 = vpop.f32.mrf.mxu0  ;;  %682 = vadd.xlane.f32.xlu1 %v681_v43  ;;  %727 = vadd.xlane.f32.xlu0 %v726_v39  ;;  %v634_v49 = vpop.f32.mrf.mxu1 }
 0x129   : > { %v1707_v50 = vadd.f32 %v1566_v42, %v570_v44  ;;  %v1710_v51 = vadd.f32 %v1566_v42, %v634_v49 }
 0x12a   : > { %v572_v54 = vpop.f32.mrf.mxu0  ;;  %v636_v55 = vpop.f32.mrf.mxu1 }
 0x12b   : > { %v684_v59 = vsel %vm641_vm1, %v1707_v50, 0.0  ;;  %v732_v2 = vsel %vm641_vm1, %v1710_v51, 0.0 }
 0x12c   : > { %v573_v62 = vpop.f32.mrf.mxu0  ;;  %730 = vadd.xlane.f32.xlu1 %v729_v53  ;;  %685 = vadd.xlane.f32.xlu0 %v684_v59  ;;  %v637_v63 = vpop.f32.mrf.mxu1 }
 0x12d   : > { %v1717_v0 = vadd.f32 %v1566_v42, %v573_v62  ;;  %v1720_v1 = vadd.f32 %v1566_v42, %v637_v63 }
 0x12e   : > { %v575_v7 = vpop.f32.mrf.mxu0  ;;  %v639_v8 = vpop.f32.mrf.mxu1 }
 0x12f   : > { %v687_v9 = vsel %vm641_vm1, %v1717_v0, 0.0  ;;  %v735_v10 = vsel %vm641_vm1, %v1720_v1, 0.0 }
 0x130   : > { %688 = vadd.xlane.f32.xlu1 %v687_v9  ;;  %733 = vadd.xlane.f32.xlu0 %v732_v2 }
 0x134   : > { %736 = vadd.xlane.f32.xlu1 %v735_v10 }
 0x17d   : > { %v644_v11 = vpop.xlane.xlu0 %643 }
 0x17e   : > { %v738_v14 = vmul.f32 0.015625, %v644_v11 }
 0x180   : > { %v1729_v17 = vsub.f32 %v1569_v45, %v738_v14 }
 0x181   : > { %v695_v42 = vpop.xlane.xlu1 %694  ;;  %v692_v18 = vpop.xlane.xlu0 %691 }
 0x182   : > { %v754_v19 = vmul.f32 0.015625, %v692_v18  ;;  %v802_v22 = vmul.f32 %v1729_v17, %v1729_v17  ;;  %v755_v23 = vmul.f32 0.015625, %v695_v42 }
 0x184   : > { %v1734_v24 = vsub.f32 %v1572_v46, %v754_v19  ;;  %v834_v27 = vsel %vm641_vm1, %v802_v22, 0.0  ;;  %v1740_v34 = vsub.f32 %v1577_v52, %v755_v23 }
 0x185   : > { %v650_v30 = vpop.xlane.xlu1 %649  ;;  %835 = vadd.xlane.f32.xlu0 %v834_v27  ;;  %v647_v31 = vpop.xlane.xlu0 %646 }
 0x186   : > { %v740_v32 = vmul.f32 0.015625, %v650_v30  ;;  %v739_v33 = vmul.f32 0.015625, %v647_v31  ;;  %v818_v45 = vmul.f32 %v1734_v24, %v1734_v24 }
 0x188   : > { %v1743_v39 = vsub.f32 %v1587_v60, %v740_v32  ;;  %v1746_v40 = vsub.f32 %v1582_v56, %v739_v33  ;;  %v882_v46 = vsel %vm641_vm1, %v818_v45, 0.0  ;;  %v819_v60 = vmul.f32 %v1740_v34, %v1740_v34 }
 0x189   : > { %v653_v41 = vpop.xlane.xlu1 %652  ;;  %883 = vadd.xlane.f32.xlu0 %v882_v46  ;;  %v698_v43 = vpop.xlane.xlu0 %697 }
 0x18a   : > { %v741_v44 = vmul.f32 0.015625, %v653_v41  ;;  %v756_v49 = vmul.f32 0.015625, %v698_v43  ;;  %v804_v53 = vmul.f32 %v1743_v39, %v1743_v39  ;;  %v803_v52 = vmul.f32 %v1746_v40, %v1746_v40 }
 0x18b   : > { %v885_v10 = vsel %vm641_vm1, %v819_v60, 0.0 }
 0x18c   : > { %v1756_v54 = vsub.f32 %v1597_v4, %v741_v44  ;;  %v1759_v56 = vsub.f32 %v1590_v61, %v756_v49  ;;  %v840_v55 = vsel %vm641_vm1, %v804_v53, 0.0  ;;  %v837_v59 = vsel %vm641_vm1, %v803_v52, 0.0 }
 0x18d   : > { %v701_v62 = vpop.xlane.xlu1 %700  ;;  %841 = vadd.xlane.f32.xlu0 %v840_v55  ;;  %838 = vadd.xlane.f32.xlu1 %v837_v59  ;;  %v656_v63 = vpop.xlane.xlu0 %655 }
 0x18e   : > { %v757_v2 = vmul.f32 0.015625, %v701_v62  ;;  %v742_v7 = vmul.f32 0.015625, %v656_v63  ;;  %v820_v8 = vmul.f32 %v1759_v56, %v1759_v56  ;;  %v805_v4 = vmul.f32 %v1756_v54, %v1756_v54 }
 0x190   : > { %v1768_v9 = vsub.f32 %v1600_v5, %v757_v2  ;;  %v1771_v61 = vsub.f32 %v1607_v12, %v742_v7  ;;  %v888_v11 = vsel %vm641_vm1, %v820_v8, 0.0  ;;  %v843_v23 = vsel %vm641_vm1, %v805_v4, 0.0 }
 0x191   : > { %v659_v14 = vpop.xlane.xlu1 %658  ;;  %886 = vadd.xlane.f32.xlu1 %v885_v10  ;;  %889 = vadd.xlane.f32.xlu0 %v888_v11  ;;  %v704_v42 = vpop.xlane.xlu0 %703 }
 0x192   : > { %v743_v18 = vmul.f32 0.015625, %v659_v14  ;;  %v758_v19 = vmul.f32 0.015625, %v704_v42  ;;  %v806_v22 = vmul.f32 %v1771_v61, %v1771_v61  ;;  %v821_v30 = vmul.f32 %v1768_v9, %v1768_v9 }
 0x194   : > { %v1779_v5 = vsub.f32 %v1617_v20, %v743_v18  ;;  %v1782_v12 = vsub.f32 %v1610_v13, %v758_v19  ;;  %v846_v27 = vsel %vm641_vm1, %v806_v22, 0.0  ;;  %v891_v43 = vsel %vm641_vm1, %v821_v30, 0.0 }
 0x195   : > { %v707_v31 = vpop.xlane.xlu1 %706  ;;  %844 = vadd.xlane.f32.xlu1 %v843_v23  ;;  %847 = vadd.xlane.f32.xlu0 %v846_v27  ;;  %v662_v32 = vpop.xlane.xlu0 %661 }
 0x196   : > { %v759_v33 = vmul.f32 0.015625, %v707_v31  ;;  %v744_v45 = vmul.f32 0.015625, %v662_v32  ;;  %v822_v46 = vmul.f32 %v1782_v12, %v1782_v12  ;;  %v807_v20 = vmul.f32 %v1779_v5, %v1779_v5 }
 0x198   : > { %v1792_v13 = vsub.f32 %v1620_v21, %v759_v33  ;;  %v1795_v41 = vsub.f32 %v1627_v28, %v744_v45  ;;  %v894_v44 = vsel %vm641_vm1, %v822_v46, 0.0  ;;  %v849_v59 = vsel %vm641_vm1, %v807_v20, 0.0 }
 0x199   : > { %v665_v49 = vpop.xlane.xlu1 %664  ;;  %892 = vadd.xlane.f32.xlu1 %v891_v43  ;;  %895 = vadd.xlane.f32.xlu0 %v894_v44  ;;  %v710_v53 = vpop.xlane.xlu0 %709 }
 0x19a   : > { %v745_v52 = vmul.f32 0.015625, %v665_v49  ;;  %v760_v60 = vmul.f32 0.015625, %v710_v53  ;;  %v808_v55 = vmul.f32 %v1795_v41, %v1795_v41  ;;  %v823_v63 = vmul.f32 %v1792_v13, %v1792_v13 }
 0x19c   : > { %v1803_v21 = vsub.f32 %v1637_v36, %v745_v52  ;;  %v1806_v28 = vsub.f32 %v1630_v29, %v760_v60  ;;  %v852_v62 = vsel %vm641_vm1, %v808_v55, 0.0  ;;  %v897_v14 = vsel %vm641_vm1, %v823_v63, 0.0 }
 0x19d   : > { %v713_v2 = vpop.xlane.xlu1 %712  ;;  %850 = vadd.xlane.f32.xlu1 %v849_v59  ;;  %853 = vadd.xlane.f32.xlu0 %v852_v62  ;;  %v668_v7 = vpop.xlane.xlu0 %667 }
 0x19e   : > { %v761_v8 = vmul.f32 0.015625, %v713_v2  ;;  %v746_v4 = vmul.f32 0.015625, %v668_v7  ;;  %v824_v10 = vmul.f32 %v1806_v28, %v1806_v28  ;;  %v809_v36 = vmul.f32 %v1803_v21, %v1803_v21 }
 0x1a0   : > { %v1816_v29 = vsub.f32 %v1640_v37, %v761_v8  ;;  %v1819_v11 = vsub.f32 %v1647_v47, %v746_v4  ;;  %v900_v42 = vsel %vm641_vm1, %v824_v10, 0.0  ;;  %v855_v30 = vsel %vm641_vm1, %v809_v36, 0.0 }
 0x1a1   : > { %v671_v18 = vpop.xlane.xlu1 %670  ;;  %898 = vadd.xlane.f32.xlu1 %v897_v14  ;;  %901 = vadd.xlane.f32.xlu0 %v900_v42  ;;  %v716_v19 = vpop.xlane.xlu0 %715 }
 0x1a2   : > { %v747_v22 = vmul.f32 0.015625, %v671_v18  ;;  %v762_v23 = vmul.f32 0.015625, %v716_v19  ;;  %v810_v27 = vmul.f32 %v1819_v11, %v1819_v11  ;;  %v825_v32 = vmul.f32 %v1816_v29, %v1816_v29 }
 0x1a4   : > { %v1827_v37 = vsub.f32 %v1657_v57, %v747_v22  ;;  %v1830_v47 = vsub.f32 %v1650_v48, %v762_v23  ;;  %v858_v31 = vsel %vm641_vm1, %v810_v27, 0.0  ;;  %v903_v49 = vsel %vm641_vm1, %v825_v32, 0.0 }
 0x1a5   : > { %v719_v33 = vpop.xlane.xlu1 %718  ;;  %856 = vadd.xlane.f32.xlu1 %v855_v30  ;;  %859 = vadd.xlane.f32.xlu0 %v858_v31  ;;  %v674_v45 = vpop.xlane.xlu0 %673 }
 0x1a6   : > { %v763_v46 = vmul.f32 0.015625, %v719_v33  ;;  %v748_v20 = vmul.f32 0.015625, %v674_v45  ;;  %v826_v43 = vmul.f32 %v1830_v47, %v1830_v47  ;;  %v811_v57 = vmul.f32 %v1827_v37, %v1827_v37 }
 0x1a8   : > { %v1840_v48 = vsub.f32 %v1660_v58, %v763_v46  ;;  %v1843_v44 = vsub.f32 %v1667_v3, %v748_v20  ;;  %v906_v53 = vsel %vm641_vm1, %v826_v43, 0.0  ;;  %v861_v63 = vsel %vm641_vm1, %v811_v57, 0.0 }
 0x1a9   : > { %v677_v52 = vpop.xlane.xlu1 %676  ;;  %904 = vadd.xlane.f32.xlu1 %v903_v49  ;;  %907 = vadd.xlane.f32.xlu0 %v906_v53  ;;  %v722_v60 = vpop.xlane.xlu0 %721 }
 0x1aa   : > { %v749_v55 = vmul.f32 0.015625, %v677_v52  ;;  %v764_v59 = vmul.f32 0.015625, %v722_v60  ;;  %v812_v62 = vmul.f32 %v1843_v44, %v1843_v44  ;;  %v827_v7 = vmul.f32 %v1840_v48, %v1840_v48 }
 0x1ac   : > { %v1851_v58 = vsub.f32 %v1677_v15, %v749_v55  ;;  %v1854_v3 = vsub.f32 %v1670_v6, %v764_v59  ;;  %v864_v2 = vsel %vm641_vm1, %v812_v62, 0.0  ;;  %v909_v18 = vsel %vm641_vm1, %v827_v7, 0.0 }
 0x1ad   : > { %v725_v8 = vpop.xlane.xlu1 %724  ;;  %862 = vadd.xlane.f32.xlu1 %v861_v63  ;;  %865 = vadd.xlane.f32.xlu0 %v864_v2  ;;  %v680_v4 = vpop.xlane.xlu0 %679 }
 0x1ae   : > { %v765_v10 = vmul.f32 0.015625, %v725_v8  ;;  %v750_v36 = vmul.f32 0.015625, %v680_v4  ;;  %v828_v14 = vmul.f32 %v1854_v3, %v1854_v3  ;;  %v813_v15 = vmul.f32 %v1851_v58, %v1851_v58 }
 0x1b0   : > { %v1864_v6 = vsub.f32 %v1680_v16, %v765_v10  ;;  %v1867_v42 = vsub.f32 %v1687_v25, %v750_v36  ;;  %v912_v19 = vsel %vm641_vm1, %v828_v14, 0.0  ;;  %v867_v32 = vsel %vm641_vm1, %v813_v15, 0.0 }
 0x1b1   : > { %v683_v22 = vpop.xlane.xlu1 %682  ;;  %910 = vadd.xlane.f32.xlu1 %v909_v18  ;;  %913 = vadd.xlane.f32.xlu0 %v912_v19  ;;  %v728_v23 = vpop.xlane.xlu0 %727 }
 0x1b2   : > { %v751_v27 = vmul.f32 0.015625, %v683_v22  ;;  %v766_v30 = vmul.f32 0.015625, %v728_v23  ;;  %v814_v31 = vmul.f32 %v1867_v42, %v1867_v42  ;;  %v829_v45 = vmul.f32 %v1864_v6, %v1864_v6 }
 0x1b4   : > { %v1875_v16 = vsub.f32 %v1697_v35, %v751_v27  ;;  %v1878_v25 = vsub.f32 %v1690_v26, %v766_v30  ;;  %v870_v33 = vsel %vm641_vm1, %v814_v31, 0.0  ;;  %v915_v52 = vsel %vm641_vm1, %v829_v45, 0.0 }
 0x1b5   : > { %v731_v46 = vpop.xlane.xlu1 %730  ;;  %868 = vadd.xlane.f32.xlu1 %v867_v32  ;;  %871 = vadd.xlane.f32.xlu0 %v870_v33  ;;  %v686_v20 = vpop.xlane.xlu0 %685 }
 0x1b6   : > { %v767_v43 = vmul.f32 0.015625, %v731_v46  ;;  %v752_v57 = vmul.f32 0.015625, %v686_v20  ;;  %v830_v49 = vmul.f32 %v1878_v25, %v1878_v25  ;;  %v815_v35 = vmul.f32 %v1875_v16, %v1875_v16 }
 0x1b8   : > { %v1888_v26 = vsub.f32 %v1700_v38, %v767_v43  ;;  %v1891_v53 = vsub.f32 %v1707_v50, %v752_v57  ;;  %v918_v60 = vsel %vm641_vm1, %v830_v49, 0.0  ;;  %v873_v7 = vsel %vm641_vm1, %v815_v35, 0.0 }
 0x1b9   : > { %v689_v55 = vpop.xlane.xlu1 %688  ;;  %916 = vadd.xlane.f32.xlu1 %v915_v52  ;;  %919 = vadd.xlane.f32.xlu0 %v918_v60  ;;  %v734_v59 = vpop.xlane.xlu0 %733 }
 0x1ba   : > { %v753_v62 = vmul.f32 0.015625, %v689_v55  ;;  %v768_v63 = vmul.f32 0.015625, %v734_v59  ;;  %v816_v2 = vmul.f32 %v1891_v53, %v1891_v53  ;;  %v831_v4 = vmul.f32 %v1888_v26, %v1888_v26 }
 0x1bc   : > { %v1899_v38 = vsub.f32 %v1717_v0, %v753_v62  ;;  %v1902_v50 = vsub.f32 %v1710_v51, %v768_v63  ;;  %v876_v8 = vsel %vm641_vm1, %v816_v2, 0.0  ;;  %v921_v0 = vsel %vm641_vm1, %v831_v4, 0.0 }
 0x1bd   : > { %v737_v10 = vpop.xlane.xlu1 %736  ;;  %874 = vadd.xlane.f32.xlu1 %v873_v7  ;;  %877 = vadd.xlane.f32.xlu0 %v876_v8 }
 0x1be   : > { %v769_v36 = vmul.f32 0.015625, %v737_v10  ;;  %v832_v14 = vmul.f32 %v1902_v50, %v1902_v50  ;;  %v817_v18 = vmul.f32 %v1899_v38, %v1899_v38  ;;  %v1923_v10 = vld [vmem:[%s2102_s2 + $0x1] ss:$0 sm:$0xff] }
 0x1c0   : > { %v1910_v15 = vsub.f32 %v1720_v1, %v769_v36  ;;  %v924_v51 = vsel %vm641_vm1, %v832_v14, 0.0  ;;  %v879_v19 = vsel %vm641_vm1, %v817_v18, 0.0 }
 0x1c1   : > { %922 = vadd.xlane.f32.xlu1 %v921_v0  ;;  %925 = vadd.xlane.f32.xlu0 %v924_v51  ;;  %v1929_v51 = vld [vmem:[%s2102_s2 + $0x2] ss:$0 sm:$0xff] }
 0x1c2   : > { %v833_v22 = vmul.f32 %v1910_v15, %v1910_v15 }
 0x1c4   : > { %v927_v23 = vsel %vm641_vm1, %v833_v22, 0.0 }
 0x1c5   : > { %880 = vadd.xlane.f32.xlu1 %v879_v19 }
 0x1c9   : > { %928 = vadd.xlane.f32.xlu1 %v927_v23 }
 0x20e   : > { %v836_v1 = vpop.xlane.xlu0 %835 }
 0x20f   : > { %v930_v27 = vmul.f32 0.015625, %v836_v1 }
 0x211   : > { %v962_v30 = vadd.f32 1e-05, %v930_v27 }
 0x212   : > { %v884_v31 = vpop.xlane.xlu0 %883 }
 0x213   : > { %1377 = vrsqrt.f32 %v962_v30  ;;  %v946_v32 = vmul.f32 0.015625, %v884_v31 }
 0x215   : > { %v978_v33 = vadd.f32 1e-05, %v946_v32 }
 0x216   : > { %v839_v45 = vpop.xlane.xlu1 %838  ;;  %v842_v46 = vpop.xlane.xlu0 %841 }
 0x217   : > { %1379 = vrsqrt.f32 %v978_v33  ;;  %v931_v20 = vmul.f32 0.015625, %v839_v45  ;;  %v932_v43 = vmul.f32 0.015625, %v842_v46 }
 0x219   : > { %v963_v57 = vadd.f32 1e-05, %v931_v20  ;;  %v964_v49 = vadd.f32 1e-05, %v932_v43 }
 0x21a   : > { %v887_v35 = vpop.xlane.xlu1 %886  ;;  %v890_v52 = vpop.xlane.xlu0 %889 }
 0x21b   : > { %1381 = vrsqrt.f32 %v963_v57  ;;  %v947_v60 = vmul.f32 0.015625, %v887_v35  ;;  %v948_v55 = vmul.f32 0.015625, %v890_v52 }
 0x21c   : > { %1383 = vrsqrt.f32 %v964_v49 }
 0x21d   : > { %v979_v59 = vadd.f32 1e-05, %v947_v60  ;;  %v980_v62 = vadd.f32 1e-05, %v948_v55 }
 0x21e   : > { %v845_v63 = vpop.xlane.xlu1 %844  ;;  %v848_v2 = vpop.xlane.xlu0 %847 }
 0x21f   : > { %1385 = vrsqrt.f32 %v979_v59  ;;  %v933_v7 = vmul.f32 0.015625, %v845_v63  ;;  %v934_v8 = vmul.f32 0.015625, %v848_v2 }
 0x220   : > { %v1378_v4 = vpop.eup %1377  ;;  %1387 = vrsqrt.f32 %v980_v62 }
 0x221   : > { %v1026_v36 = vmul.f32 %v1378_v4, %v1729_v17  ;;  %v965_v14 = vadd.f32 1e-05, %v933_v7  ;;  %v966_v0 = vadd.f32 1e-05, %v934_v8 }
 0x222   : > { %v893_v18 = vpop.xlane.xlu1 %892  ;;  %v896_v19 = vpop.xlane.xlu0 %895 }
 0x223   : > { %v1063_v22 = vmul.f32 %v1923_v10, %v1026_v36  ;;  %1389 = vrsqrt.f32 %v965_v14  ;;  %v949_v23 = vmul.f32 0.015625, %v893_v18  ;;  %v950_v1 = vmul.f32 0.015625, %v896_v19 }
 0x224   : > { %v1380_v27 = vpop.eup %1379  ;;  %1391 = vrsqrt.f32 %v966_v0 }
 0x225   : > { %v1100_v17 = vadd.f32 %v1929_v51, %v1063_v22  ;;  %v1042_v30 = vmul.f32 %v1380_v27, %v1734_v24  ;;  %v981_v31 = vadd.f32 1e-05, %v949_v23  ;;  %v982_v32 = vadd.f32 1e-05, %v950_v1 }
 0x226   : > { %v851_v33 = vpop.xlane.xlu1 %850  ;;  %v854_v45 = vpop.xlane.xlu0 %853 }
 0x227   : > { %1132 = vst.msk [vmem:[%s1937_s20] sm:$0xff] %vm641_vm1, %v1100_v17  ;;  %v1079_v46 = vmul.f32 %v1923_v10, %v1042_v30  ;;  %1393 = vrsqrt.f32 %v981_v31  ;;  %v935_v20 = vmul.f32 0.015625, %v851_v33  ;;  %v936_v43 = vmul.f32 0.015625, %v854_v45 }
 0x228   : > { %v1382_v57 = vpop.eup %1381  ;;  %1395 = vrsqrt.f32 %v982_v32 }
 0x229   : > { %v1384_v49 = vpop.eup %1383  ;;  %v1116_v35 = vadd.f32 %v1929_v51, %v1079_v46  ;;  %v1027_v52 = vmul.f32 %v1382_v57, %v1746_v40  ;;  %v967_v24 = vadd.f32 1e-05, %v935_v20  ;;  %v968_v60 = vadd.f32 1e-05, %v936_v43 }
 0x22a   : > { %v1028_v55 = vmul.f32 %v1384_v49, %v1743_v39  ;;  %v899_v59 = vpop.xlane.xlu1 %898  ;;  %v902_v62 = vpop.xlane.xlu0 %901 }
 0x22b   : > { %1148 = vst.msk [vmem:[%s1937_s20 + $0x80] sm:$0xff] %vm641_vm1, %v1116_v35  ;;  %v1064_v63 = vmul.f32 %v1923_v10, %v1027_v52  ;;  %1397 = vrsqrt.f32 %v967_v24  ;;  %v951_v2 = vmul.f32 0.015625, %v899_v59  ;;  %v952_v7 = vmul.f32 0.015625, %v902_v62 }
 0x22c   : > { %v1386_v8 = vpop.eup %1385  ;;  %v1065_v4 = vmul.f32 %v1923_v10, %v1028_v55  ;;  %1399 = vrsqrt.f32 %v968_v60 }
 0x22d   : > { %v1388_v40 = vpop.eup %1387  ;;  %v1101_v36 = vadd.f32 %v1929_v51, %v1064_v63  ;;  %v1043_v39 = vmul.f32 %v1386_v8, %v1740_v34  ;;  %v983_v14 = vadd.f32 1e-05, %v951_v2  ;;  %v984_v0 = vadd.f32 1e-05, %v952_v7 }
 0x22e   : > { %v1102_v18 = vadd.f32 %v1929_v51, %v1065_v4  ;;  %v1044_v19 = vmul.f32 %v1388_v40, %v1759_v56  ;;  %v857_v22 = vpop.xlane.xlu1 %856  ;;  %v860_v23 = vpop.xlane.xlu0 %859 }
 0x22f   : > { %1133 = vst.msk [vmem:[%s1937_s20 + $0x8] sm:$0xff] %vm641_vm1, %v1101_v36  ;;  %v1080_v1 = vmul.f32 %v1923_v10, %v1043_v39  ;;  %1401 = vrsqrt.f32 %v983_v14  ;;  %v937_v27 = vmul.f32 0.015625, %v857_v22  ;;  %v938_v17 = vmul.f32 0.015625, %v860_v23 }
 0x230   : > { %v1390_v30 = vpop.eup %1389  ;;  %1134 = vst.msk [vmem:[%s1937_s20 + $0x10] sm:$0xff] %vm641_vm1, %v1102_v18  ;;  %v1081_v34 = vmul.f32 %v1923_v10, %v1044_v19  ;;  %1403 = vrsqrt.f32 %v984_v0 }
 0x231   : > { %v1392_v31 = vpop.eup %1391  ;;  %v1117_v56 = vadd.f32 %v1929_v51, %v1080_v1  ;;  %v1029_v32 = vmul.f32 %v1390_v30, %v1756_v54  ;;  %v969_v33 = vadd.f32 1e-05, %v937_v27  ;;  %v970_v45 = vadd.f32 1e-05, %v938_v17 }
 0x232   : > { %v1118_v46 = vadd.f32 %v1929_v51, %v1081_v34  ;;  %v1030_v20 = vmul.f32 %v1392_v31, %v1771_v61  ;;  %v905_v43 = vpop.xlane.xlu1 %904  ;;  %v908_v57 = vpop.xlane.xlu0 %907 }
 0x233   : > { %1149 = vst.msk [vmem:[%s1937_s20 + $0x88] sm:$0xff] %vm641_vm1, %v1117_v56  ;;  %v1066_v49 = vmul.f32 %v1923_v10, %v1029_v32  ;;  %1405 = vrsqrt.f32 %v969_v33  ;;  %v953_v35 = vmul.f32 0.015625, %v905_v43  ;;  %v954_v52 = vmul.f32 0.015625, %v908_v57 }
 0x234   : > { %v1394_v24 = vpop.eup %1393  ;;  %1150 = vst.msk [vmem:[%s1937_s20 + $0x90] sm:$0xff] %vm641_vm1, %v1118_v46  ;;  %v1067_v54 = vmul.f32 %v1923_v10, %v1030_v20  ;;  %1407 = vrsqrt.f32 %v970_v45 }
 0x235   : > { %v1396_v60 = vpop.eup %1395  ;;  %v1103_v61 = vadd.f32 %v1929_v51, %v1066_v49  ;;  %v1045_v55 = vmul.f32 %v1394_v24, %v1768_v9  ;;  %v985_v59 = vadd.f32 1e-05, %v953_v35  ;;  %v986_v62 = vadd.f32 1e-05, %v954_v52 }
 0x236   : > { %v1104_v63 = vadd.f32 %v1929_v51, %v1067_v54  ;;  %v1046_v2 = vmul.f32 %v1396_v60, %v1782_v12  ;;  %v863_v7 = vpop.xlane.xlu1 %862  ;;  %v866_v8 = vpop.xlane.xlu0 %865 }
 0x237   : > { %1135 = vst.msk [vmem:[%s1937_s20 + $0x18] sm:$0xff] %vm641_vm1, %v1103_v61  ;;  %v1082_v4 = vmul.f32 %v1923_v10, %v1045_v55  ;;  %1409 = vrsqrt.f32 %v985_v59  ;;  %v939_v40 = vmul.f32 0.015625, %v863_v7  ;;  %v940_v36 = vmul.f32 0.015625, %v866_v8 }
 0x238   : > { %v1398_v39 = vpop.eup %1397  ;;  %1136 = vst.msk [vmem:[%s1937_s20 + $0x20] sm:$0xff] %vm641_vm1, %v1104_v63  ;;  %v1083_v9 = vmul.f32 %v1923_v10, %v1046_v2  ;;  %1411 = vrsqrt.f32 %v986_v62 }
 0x239   : > { %v1400_v14 = vpop.eup %1399  ;;  %v1119_v12 = vadd.f32 %v1929_v51, %v1082_v4  ;;  %v1031_v0 = vmul.f32 %v1398_v39, %v1779_v5  ;;  %v971_v18 = vadd.f32 1e-05, %v939_v40  ;;  %v972_v19 = vadd.f32 1e-05, %v940_v36 }
 0x23a   : > { %v1120_v22 = vadd.f32 %v1929_v51, %v1083_v9  ;;  %v1032_v23 = vmul.f32 %v1400_v14, %v1795_v41  ;;  %v911_v1 = vpop.xlane.xlu1 %910  ;;  %v914_v27 = vpop.xlane.xlu0 %913 }
 0x23b   : > { %1151 = vst.msk [vmem:[%s1937_s20 + $0x98] sm:$0xff] %vm641_vm1, %v1119_v12  ;;  %v1068_v17 = vmul.f32 %v1923_v10, %v1031_v0  ;;  %1413 = vrsqrt.f32 %v971_v18  ;;  %v955_v30 = vmul.f32 0.015625, %v911_v1  ;;  %v956_v34 = vmul.f32 0.015625, %v914_v27 }
 0x23c   : > { %v1402_v31 = vpop.eup %1401  ;;  %1152 = vst.msk [vmem:[%s1937_s20 + $0xa0] sm:$0xff] %vm641_vm1, %v1120_v22  ;;  %v1069_v5 = vmul.f32 %v1923_v10, %v1032_v23  ;;  %1415 = vrsqrt.f32 %v972_v19 }
 0x23d   : > { %v1404_v56 = vpop.eup %1403  ;;  %v1105_v41 = vadd.f32 %v1929_v51, %v1068_v17  ;;  %v1047_v32 = vmul.f32 %v1402_v31, %v1792_v13  ;;  %v987_v33 = vadd.f32 1e-05, %v955_v30  ;;  %v988_v45 = vadd.f32 1e-05, %v956_v34 }
 0x23e   : > { %v1106_v46 = vadd.f32 %v1929_v51, %v1069_v5  ;;  %v1048_v20 = vmul.f32 %v1404_v56, %v1806_v28  ;;  %v869_v43 = vpop.xlane.xlu1 %868  ;;  %v872_v57 = vpop.xlane.xlu0 %871 }
 0x23f   : > { %1137 = vst.msk [vmem:[%s1937_s20 + $0x28] sm:$0xff] %vm641_vm1, %v1105_v41  ;;  %v1084_v49 = vmul.f32 %v1923_v10, %v1047_v32  ;;  %1417 = vrsqrt.f32 %v987_v33  ;;  %v941_v35 = vmul.f32 0.015625, %v869_v43  ;;  %v942_v52 = vmul.f32 0.015625, %v872_v57 }
 0x240   : > { %v1406_v24 = vpop.eup %1405  ;;  %1138 = vst.msk [vmem:[%s1937_s20 + $0x30] sm:$0xff] %vm641_vm1, %v1106_v46  ;;  %v1085_v13 = vmul.f32 %v1923_v10, %v1048_v20  ;;  %1419 = vrsqrt.f32 %v988_v45 }
 0x241   : > { %v1408_v54 = vpop.eup %1407  ;;  %v1121_v28 = vadd.f32 %v1929_v51, %v1084_v49  ;;  %v1033_v60 = vmul.f32 %v1406_v24, %v1803_v21  ;;  %v973_v61 = vadd.f32 1e-05, %v941_v35  ;;  %v974_v55 = vadd.f32 1e-05, %v942_v52 }
 0x242   : > { %v1122_v59 = vadd.f32 %v1929_v51, %v1085_v13  ;;  %v1034_v62 = vmul.f32 %v1408_v54, %v1819_v11  ;;  %v917_v63 = vpop.xlane.xlu1 %916  ;;  %v920_v2 = vpop.xlane.xlu0 %919 }
 0x243   : > { %1153 = vst.msk [vmem:[%s1937_s20 + $0xa8] sm:$0xff] %vm641_vm1, %v1121_v28  ;;  %v1070_v7 = vmul.f32 %v1923_v10, %v1033_v60  ;;  %1421 = vrsqrt.f32 %v973_v61  ;;  %v957_v8 = vmul.f32 0.015625, %v917_v63  ;;  %v958_v4 = vmul.f32 0.015625, %v920_v2 }
 0x244   : > { %v1410_v40 = vpop.eup %1409  ;;  %1154 = vst.msk [vmem:[%s1937_s20 + $0xb0] sm:$0xff] %vm641_vm1, %v1122_v59  ;;  %v1071_v21 = vmul.f32 %v1923_v10, %v1034_v62  ;;  %1423 = vrsqrt.f32 %v974_v55 }
 0x245   : > { %v1412_v36 = vpop.eup %1411  ;;  %v1107_v11 = vadd.f32 %v1929_v51, %v1070_v7  ;;  %v1049_v39 = vmul.f32 %v1410_v40, %v1816_v29  ;;  %v989_v9 = vadd.f32 1e-05, %v957_v8  ;;  %v990_v14 = vadd.f32 1e-05, %v958_v4 }
 0x246   : > { %v1108_v12 = vadd.f32 %v1929_v51, %v1071_v21  ;;  %v1050_v0 = vmul.f32 %v1412_v36, %v1830_v47  ;;  %v875_v18 = vpop.xlane.xlu1 %874  ;;  %v878_v19 = vpop.xlane.xlu0 %877 }
 0x247   : > { %1139 = vst.msk [vmem:[%s1937_s20 + $0x38] sm:$0xff] %vm641_vm1, %v1107_v11  ;;  %v1086_v22 = vmul.f32 %v1923_v10, %v1049_v39  ;;  %1425 = vrsqrt.f32 %v989_v9  ;;  %v943_v23 = vmul.f32 0.015625, %v875_v18  ;;  %v944_v1 = vmul.f32 0.015625, %v878_v19 }
 0x248   : > { %v1414_v27 = vpop.eup %1413  ;;  %1140 = vst.msk [vmem:[%s1937_s20 + $0x40] sm:$0xff] %vm641_vm1, %v1108_v12  ;;  %v1087_v29 = vmul.f32 %v1923_v10, %v1050_v0  ;;  %1427 = vrsqrt.f32 %v990_v14 }
 0x249   : > { %v1416_v17 = vpop.eup %1415  ;;  %v1123_v47 = vadd.f32 %v1929_v51, %v1086_v22  ;;  %v1035_v30 = vmul.f32 %v1414_v27, %v1827_v37  ;;  %v975_v34 = vadd.f32 1e-05, %v943_v23  ;;  %v976_v31 = vadd.f32 1e-05, %v944_v1 }
 0x24a   : > { %v1124_v5 = vadd.f32 %v1929_v51, %v1087_v29  ;;  %v1036_v56 = vmul.f32 %v1416_v17, %v1843_v44  ;;  %v923_v41 = vpop.xlane.xlu1 %922  ;;  %v926_v32 = vpop.xlane.xlu0 %925 }
 0x24b   : > { %1155 = vst.msk [vmem:[%s1937_s20 + $0xb8] sm:$0xff] %vm641_vm1, %v1123_v47  ;;  %v1072_v33 = vmul.f32 %v1923_v10, %v1035_v30  ;;  %1429 = vrsqrt.f32 %v975_v34  ;;  %v959_v45 = vmul.f32 0.015625, %v923_v41  ;;  %v960_v46 = vmul.f32 0.015625, %v926_v32 }
 0x24c   : > { %v1418_v20 = vpop.eup %1417  ;;  %1156 = vst.msk [vmem:[%s1937_s20 + $0xc0] sm:$0xff] %vm641_vm1, %v1124_v5  ;;  %v1073_v37 = vmul.f32 %v1923_v10, %v1036_v56  ;;  %1431 = vrsqrt.f32 %v976_v31 }
 0x24d   : > { %v1420_v43 = vpop.eup %1419  ;;  %v1109_v44 = vadd.f32 %v1929_v51, %v1072_v33  ;;  %v1051_v57 = vmul.f32 %v1418_v20, %v1840_v48  ;;  %v991_v49 = vadd.f32 1e-05, %v959_v45  ;;  %v992_v35 = vadd.f32 1e-05, %v960_v46 }
 0x24e   : > { %v1110_v52 = vadd.f32 %v1929_v51, %v1073_v37  ;;  %v1052_v24 = vmul.f32 %v1420_v43, %v1854_v3  ;;  %v881_v13 = vpop.xlane.xlu1 %880 }
 0x24f   : > { %1141 = vst.msk [vmem:[%s1937_s20 + $0x48] sm:$0xff] %vm641_vm1, %v1109_v44  ;;  %v1088_v54 = vmul.f32 %v1923_v10, %v1051_v57  ;;  %1433 = vrsqrt.f32 %v991_v49  ;;  %v945_v28 = vmul.f32 0.015625, %v881_v13 }
 0x250   : > { %v1422_v60 = vpop.eup %1421  ;;  %1142 = vst.msk [vmem:[%s1937_s20 + $0x50] sm:$0xff] %vm641_vm1, %v1110_v52  ;;  %v1089_v48 = vmul.f32 %v1923_v10, %v1052_v24  ;;  %1435 = vrsqrt.f32 %v992_v35 }
 0x251   : > { %v1424_v61 = vpop.eup %1423  ;;  %v1125_v55 = vadd.f32 %v1929_v51, %v1088_v54  ;;  %v1037_v3 = vmul.f32 %v1422_v60, %v1851_v58  ;;  %v977_v59 = vadd.f32 1e-05, %v945_v28 }
 0x252   : > { %v1126_v62 = vadd.f32 %v1929_v51, %v1089_v48  ;;  %v1038_v63 = vmul.f32 %v1424_v61, %v1867_v42  ;;  %v929_v2 = vpop.xlane.xlu1 %928 }
 0x253   : > { %1157 = vst.msk [vmem:[%s1937_s20 + $0xc8] sm:$0xff] %vm641_vm1, %v1125_v55  ;;  %v1074_v7 = vmul.f32 %v1923_v10, %v1037_v3  ;;  %1437 = vrsqrt.f32 %v977_v59  ;;  %v961_v8 = vmul.f32 0.015625, %v929_v2 }
 0x254   : > { %v1426_v4 = vpop.eup %1425  ;;  %1158 = vst.msk [vmem:[%s1937_s20 + $0xd0] sm:$0xff] %vm641_vm1, %v1126_v62  ;;  %v1075_v40 = vmul.f32 %v1923_v10, %v1038_v63 }
 0x255   : > { %v1428_v58 = vpop.eup %1427  ;;  %v1111_v21 = vadd.f32 %v1929_v51, %v1074_v7  ;;  %v1053_v36 = vmul.f32 %v1426_v4, %v1864_v6  ;;  %v993_v42 = vadd.f32 1e-05, %v961_v8 }
 0x256   : > { %v1112_v11 = vadd.f32 %v1929_v51, %v1075_v40  ;;  %v1054_v39 = vmul.f32 %v1428_v58, %v1878_v25 }
 0x257   : > { %1143 = vst.msk [vmem:[%s1937_s20 + $0x58] sm:$0xff] %vm641_vm1, %v1111_v21  ;;  %v1090_v9 = vmul.f32 %v1923_v10, %v1053_v36  ;;  %1439 = vrsqrt.f32 %v993_v42 }
 0x258   : > { %v1430_v14 = vpop.eup %1429  ;;  %1144 = vst.msk [vmem:[%s1937_s20 + $0x60] sm:$0xff] %vm641_vm1, %v1112_v11  ;;  %v1091_v12 = vmul.f32 %v1923_v10, %v1054_v39 }
 0x259   : > { %v1432_v0 = vpop.eup %1431  ;;  %v1127_v6 = vadd.f32 %v1929_v51, %v1090_v9  ;;  %v1039_v18 = vmul.f32 %v1430_v14, %v1875_v16 }
 0x25a   : > { %v1128_v19 = vadd.f32 %v1929_v51, %v1091_v12  ;;  %v1040_v25 = vmul.f32 %v1432_v0, %v1891_v53 }
 0x25b   : > { %1159 = vst.msk [vmem:[%s1937_s20 + $0xd8] sm:$0xff] %vm641_vm1, %v1127_v6  ;;  %v1076_v22 = vmul.f32 %v1923_v10, %v1039_v18 }
 0x25c   : > { %v1434_v23 = vpop.eup %1433  ;;  %1160 = vst.msk [vmem:[%s1937_s20 + $0xe0] sm:$0xff] %vm641_vm1, %v1128_v19  ;;  %v1077_v1 = vmul.f32 %v1923_v10, %v1040_v25 }
 0x25d   : > { %v1436_v27 = vpop.eup %1435  ;;  %v1113_v29 = vadd.f32 %v1929_v51, %v1076_v22  ;;  %v1055_v16 = vmul.f32 %v1434_v23, %v1888_v26 }
 0x25e   : > { %v1114_v17 = vadd.f32 %v1929_v51, %v1077_v1  ;;  %v1056_v53 = vmul.f32 %v1436_v27, %v1902_v50 }
 0x25f   : > { %1145 = vst.msk [vmem:[%s1937_s20 + $0x68] sm:$0xff] %vm641_vm1, %v1113_v29  ;;  %v1092_v47 = vmul.f32 %v1923_v10, %v1055_v16 }
 0x260   : > { %v1438_v30 = vpop.eup %1437  ;;  %1146 = vst.msk [vmem:[%s1937_s20 + $0x70] sm:$0xff] %vm641_vm1, %v1114_v17  ;;  %v1093_v34 = vmul.f32 %v1923_v10, %v1056_v53 }
 0x261   : > { %v1129_v31 = vadd.f32 %v1929_v51, %v1092_v47  ;;  %v1041_v5 = vmul.f32 %v1438_v30, %v1899_v38 }
 0x262   : > { %v1130_v26 = vadd.f32 %v1929_v51, %v1093_v34 }
 0x263   : > { %1161 = vst.msk [vmem:[%s1937_s20 + $0xe8] sm:$0xff] %vm641_vm1, %v1129_v31  ;;  %v1078_v50 = vmul.f32 %v1923_v10, %v1041_v5 }
 0x264   : > { %v1440_v56 = vpop.eup %1439  ;;  %1162 = vst.msk [vmem:[%s1937_s20 + $0xf0] sm:$0xff] %vm641_vm1, %v1130_v26 }
 0x265   : > { %v1115_v41 = vadd.f32 %v1929_v51, %v1078_v50  ;;  %v1057_v32 = vmul.f32 %v1440_v56, %v1910_v15 }
 0x267   : > { %1147 = vst.msk [vmem:[%s1937_s20 + $0x78] sm:$0xff] %vm641_vm1, %v1115_v41  ;;  %v1094_v33 = vmul.f32 %v1923_v10, %v1057_v32 }
 0x269   : > { %v1131_v45 = vadd.f32 %v1929_v51, %v1094_v33 }
 0x26b   : > { %1163 = vst.msk [vmem:[%s1937_s20 + $0xf8] sm:$0xff] %vm641_vm1, %v1131_v45 }
 0x26c PF: > { %s13_s12 = sadd.s32 1, %s1447_s12  }
 0x26d   : > { %p10_p4 = scmp.ge.s32.totalorder %s13_s12, 4  }
 0x26f   :  { %12 = sbr.rel (!%p10_p4) target bundleno = 1 (0x1), region = 62 }

</bundles_post_ra>
